<compile_context>
chip_gen: v6e
topology: v6e:2x2x1
jax: 0.10.0
libtpu: 0.0.40
codegen_flags: <defaults>
</compile_context>

<pallas_src>
import math
import jax
import jax.numpy as jnp
from jax.experimental import pallas as pl
from jax.experimental.pallas import tpu as pltpu

# ----------------------------- problem sizes ---------------------------------
BATCH = 2
N_HEADS = 2
SEQ = 8          # len_q == len_k
D_K = 16
D_V = 16


# ------------------------------ Pallas kernel --------------------------------
def sdpa_kernel(q_ref, k_ref, v_ref, mask_ref, ctx_ref, attn_ref):
    """Single-program scaled dot-product attention over folded (batch*heads).

    q_ref    : [G, S, D_K]
    k_ref    : [G, S, D_K]
    v_ref    : [G, S, D_V]
    mask_ref : [G, S, S]   (1.0 where masked, 0.0 otherwise)
    ctx_ref  : [G, S, D_V]
    attn_ref : [G, S, S]
    """
    q = q_ref[...]
    k = k_ref[...]
    v = v_ref[...]
    mask = mask_ref[...]

    inv_sqrt_dk = 1.0 / math.sqrt(D_K)

    # scores = Q @ K^T / sqrt(d_k)  — batched over G, contraction on last axes,
    # no explicit transpose materialized.
    scores = jnp.einsum('gqd,gkd->gqk', q, k,
                        preferred_element_type=jnp.float32) * inv_sqrt_dk

    # masked_fill_(attn_mask, -1e9)
    scores = jnp.where(mask > 0.5, -1e9, scores)

    # numerically-stable softmax along keys
    m = jnp.max(scores, axis=-1, keepdims=True)
    e = jnp.exp(scores - m)
    denom = jnp.sum(e, axis=-1, keepdims=True)
    attn = e * pl.reciprocal(denom, approx=True)

    # single lane-contiguous store for the whole attention map (no per-head stores)
    attn_ref[...] = attn

    # context = attn @ V  (batched over G)
    ctx_ref[...] = jnp.einsum('gqk,gkd->gqd', attn, v,
                              preferred_element_type=jnp.float32)


# ------------------------------ wrapper ---------------------------------------
def scaled_dot_product_attention(Q, K, V, attn_mask):
    """Q: [B,H,Lq,Dk], K: [B,H,Lk,Dk], V: [B,H,Lk,Dv], attn_mask: [B,H,Lq,Lk] bool."""
    B, H, Lq, Dk = Q.shape
    Lk = K.shape[2]
    Dv = V.shape[3]
    G = B * H

    # fold batch and heads into one leading axis (free reshape, contiguous)
    q3 = Q.reshape(G, Lq, Dk)
    k3 = K.reshape(G, Lk, Dk)
    v3 = V.reshape(G, Lk, Dv)
    m3 = attn_mask.astype(jnp.float32).reshape(G, Lq, Lk)

    vmem = pltpu.MemorySpace.VMEM
    ctx, attn = pl.pallas_call(
        sdpa_kernel,
        out_shape=(
            jax.ShapeDtypeStruct((G, Lq, Dv), jnp.float32),
            jax.ShapeDtypeStruct((G, Lq, Lk), jnp.float32),
        ),
        in_specs=[
            pl.BlockSpec(memory_space=vmem),   # Q
            pl.BlockSpec(memory_space=vmem),   # K
            pl.BlockSpec(memory_space=vmem),   # V
            pl.BlockSpec(memory_space=vmem),   # mask
        ],
        out_specs=(
            pl.BlockSpec(memory_space=vmem),
            pl.BlockSpec(memory_space=vmem),
        ),
    )(q3, k3, v3, m3)

    return ctx.reshape(B, H, Lq, Dv), attn.reshape(B, H, Lq, Lk)


# ------------------------------ pure-JAX reference -----------------------------
def ref_sdpa(Q, K, V, attn_mask):
    scores = jnp.einsum('bhqd,bhkd->bhqk', Q, K) / math.sqrt(D_K)
    scores = jnp.where(attn_mask, -1e9, scores)
    attn = jax.nn.softmax(scores, axis=-1)
    ctx = jnp.einsum('bhqk,bhkd->bhqd', attn, V)
    return ctx, attn


# ----------------------------------- main --------------------------------------
if __name__ == "__main__":
    key = jax.random.PRNGKey(0)
    kq, kk, kv = jax.random.split(key, 3)

    Q = jax.random.normal(kq, (BATCH, N_HEADS, SEQ, D_K), jnp.float32)
    K = jax.random.normal(kk, (BATCH, N_HEADS, SEQ, D_K), jnp.float32)
    V = jax.random.normal(kv, (BATCH, N_HEADS, SEQ, D_V), jnp.float32)

    # pad-style mask: last two key positions of batch 0 are padding
    key_is_pad = jnp.zeros((BATCH, SEQ), dtype=bool).at[0, -2:].set(True)
    attn_mask = jnp.broadcast_to(key_is_pad[:, None, None, :],
                                 (BATCH, N_HEADS, SEQ, SEQ))

    ctx, attn = scaled_dot_product_attention(Q, K, V, attn_mask)
    ctx = jax.block_until_ready(ctx)
    attn = jax.block_until_ready(attn)

    # shape / sanity checks against the reference semantics
    assert ctx.shape == (BATCH, N_HEADS, SEQ, D_V)
    assert attn.shape == (BATCH, N_HEADS, SEQ, SEQ)
    assert bool(jnp.all(jnp.isfinite(ctx)))
    assert bool(jnp.all(jnp.isfinite(attn)))

    ref_ctx, ref_attn = ref_sdpa(Q, K, V, attn_mask)
    assert bool(jnp.allclose(attn, ref_attn, atol=1e-2, rtol=1e-2))
    assert bool(jnp.allclose(ctx, ref_ctx, atol=1e-2, rtol=1e-2))
    # masked key columns must receive ~zero attention
    assert bool(jnp.all(attn[0, :, :, -2:] < 1e-6))

    print("KERNEL_OK")
</pallas_src>

<mosaic_0001>
module attributes {stable_mosaic.version = 11 : i64} {
  func.func @sdpa_kernel(%arg0: memref<4x8x16xf32, #tpu.memory_space<vmem>>, %arg1: memref<4x8x16xf32, #tpu.memory_space<vmem>>, %arg2: memref<4x8x16xf32, #tpu.memory_space<vmem>>, %arg3: memref<4x8x8xf32, #tpu.memory_space<vmem>>, %arg4: memref<4x8x16xf32, #tpu.memory_space<vmem>>, %arg5: memref<4x8x8xf32, #tpu.memory_space<vmem>>) attributes {dimension_semantics = [], scalar_prefetch = 0 : i64, scratch_operands = 0 : i64, tpu.core_type = #tpu.core_type<tc>} {
    %c0 = arith.constant 0 : index
    %c0_0 = arith.constant 0 : index
    %c0_1 = arith.constant 0 : index
    %0 = vector.load %arg0[%c0, %c0_0, %c0_1] : memref<4x8x16xf32, #tpu.memory_space<vmem>>, vector<4x8x16xf32>
    %c0_2 = arith.constant 0 : index
    %c0_3 = arith.constant 0 : index
    %c0_4 = arith.constant 0 : index
    %1 = vector.load %arg1[%c0_2, %c0_3, %c0_4] : memref<4x8x16xf32, #tpu.memory_space<vmem>>, vector<4x8x16xf32>
    %c0_5 = arith.constant 0 : index
    %c0_6 = arith.constant 0 : index
    %c0_7 = arith.constant 0 : index
    %2 = vector.load %arg2[%c0_5, %c0_6, %c0_7] : memref<4x8x16xf32, #tpu.memory_space<vmem>>, vector<4x8x16xf32>
    %c0_8 = arith.constant 0 : index
    %c0_9 = arith.constant 0 : index
    %c0_10 = arith.constant 0 : index
    %3 = vector.load %arg3[%c0_8, %c0_9, %c0_10] : memref<4x8x8xf32, #tpu.memory_space<vmem>>, vector<4x8x8xf32>
    "tpu.trace_start"() <{level = 10 : i32, message = "gqd,gkd->gqk"}> : () -> ()
    %cst = arith.constant dense<0.000000e+00> : vector<4x8x8xf32>
    %4 = tpu.matmul %0, %1, %cst {dimension_numbers = #tpu.dot_dimension_numbers<[2], [2], [1], [1], [0, 0, 0, 1, 1, 1], [0], [0]>} : vector<4x8x16xf32>, vector<4x8x16xf32>, vector<4x8x8xf32> -> vector<4x8x8xf32>
    "tpu.trace_stop"() : () -> ()
    %cst_11 = arith.constant 2.500000e-01 : f32
    %5 = vector.broadcast %cst_11 : f32 to vector<4x8x8xf32>
    %6 = arith.mulf %4, %5 : vector<4x8x8xf32>
    %cst_12 = arith.constant 5.000000e-01 : f32
    %7 = vector.broadcast %cst_12 : f32 to vector<4x8x8xf32>
    %8 = arith.cmpf ogt, %3, %7 : vector<4x8x8xf32>
    %cst_13 = arith.constant -1.000000e+09 : f32
    %9 = vector.broadcast %cst_13 : f32 to vector<4x8x8xf32>
    %10 = arith.select %8, %9, %6 : vector<4x8x8xi1>, vector<4x8x8xf32>
    %cst_14 = arith.constant dense<0xFF800000> : vector<4x8xf32>
    %11 = vector.multi_reduction <maximumf>, %10, %cst_14 [2] : vector<4x8x8xf32> to vector<4x8xf32>
    %12 = vector.shape_cast %11 : vector<4x8xf32> to vector<4x8x1xf32>
    %13 = vector.broadcast %12 : vector<4x8x1xf32> to vector<4x8x8xf32>
    %14 = arith.subf %10, %13 : vector<4x8x8xf32>
    %15 = math.exp %14 : vector<4x8x8xf32>
    %cst_15 = arith.constant dense<0.000000e+00> : vector<4x8xf32>
    %16 = vector.multi_reduction <add>, %15, %cst_15 [2] : vector<4x8x8xf32> to vector<4x8xf32>
    %17 = vector.shape_cast %16 : vector<4x8xf32> to vector<4x8x1xf32>
    %18 = tpu.reciprocal %17 {approx = true} : vector<4x8x1xf32> -> vector<4x8x1xf32>
    %19 = vector.broadcast %18 : vector<4x8x1xf32> to vector<4x8x8xf32>
    %20 = arith.mulf %15, %19 : vector<4x8x8xf32>
    %c0_16 = arith.constant 0 : index
    %c0_17 = arith.constant 0 : index
    %c0_18 = arith.constant 0 : index
    %21 = vector.load %arg5[%c0_16, %c0_17, %c0_18] : memref<4x8x8xf32, #tpu.memory_space<vmem>>, vector<4x8x8xf32>
    tpu.vector_store %arg5[%c0_16, %c0_17, %c0_18], %20 {strides = array<i32>} : memref<4x8x8xf32, #tpu.memory_space<vmem>>, vector<4x8x8xf32>,
    "tpu.trace_start"() <{level = 10 : i32, message = "gqk,gkd->gqd"}> : () -> ()
    %cst_19 = arith.constant dense<0.000000e+00> : vector<4x8x16xf32>
    %22 = tpu.matmul %20, %2, %cst_19 {dimension_numbers = #tpu.dot_dimension_numbers<[2], [1], [1], [2], [0, 0, 0, 1, 1, 2], [0], [0]>} : vector<4x8x8xf32>, vector<4x8x16xf32>, vector<4x8x16xf32> -> vector<4x8x16xf32>
    "tpu.trace_stop"() : () -> ()
    %c0_20 = arith.constant 0 : index
    %c0_21 = arith.constant 0 : index
    %c0_22 = arith.constant 0 : index
    %23 = vector.load %arg4[%c0_20, %c0_21, %c0_22] : memref<4x8x16xf32, #tpu.memory_space<vmem>>, vector<4x8x16xf32>
    tpu.vector_store %arg4[%c0_20, %c0_21, %c0_22], %22 {strides = array<i32>} : memref<4x8x16xf32, #tpu.memory_space<vmem>>, vector<4x8x16xf32>,
    return
  }
}

</mosaic_0001>

<bundles_post_ra>
// kernel: tpu_custom_call.1
= control target key start
LH: loop header
LB: loop body
LE: loop exit
PB: predicated region body
PF: predicated region fallthrough
CT: control target
= control target key end

     0   :  { %11 = vsyncpa [#allocation3], 0  ;;  %s1141_s0 = inlined_call_operand.hbm [shape: f32[4,8,16], index: 0, kind: input, shape index: {}]   ;;  %s1142_s1 = inlined_call_operand.hbm [shape: f32[4,8,16], index: 1, kind: input, shape index: {}]   ;;  %s1143_s2 = inlined_call_operand.hbm [shape: f32[4,8,16], index: 2, kind: input, shape index: {}]   ;;  %s1144_s3 = inlined_call_operand.hbm [shape: f32[4,8,8], index: 3, kind: input, shape index: {}]   ;;  %s1145_s4 = inlined_call_operand.hbm [shape: f32[4,8,16], index: 4, kind: output, shape index: {0}]   ;;  %s1146_s5 = inlined_call_operand.hbm [shape: f32[4,8,8], index: 5, kind: output, shape index: {1}]  }
   0x1   :  { %12 = vsyncpa [#allocation6], 0 }
   0x2   :  { %13 = vsyncpa [#allocation9], 0 }
   0x3   :  { %14 = vsyncpa [#allocation4], 0 }
   0x4   :  { %15 = vsyncpa [#allocation12], 0  ;;  %s1013_s18 = smov [#allocation5]   ;;  %s1014_s20 = smov [#allocation2]  }
   0x5   :  { %s33_s19 = sshll.u32 %s1013_s18, 4  ;;  %s21_s21 = sshll.u32 %s1014_s20, 4  ;;  %s34_s19 = int_to_ptr.vmem [resolvable:$true] %s33_s19  ;;  %s22_s21 = int_to_ptr.vmem [resolvable:$true] %s21_s21 }
   0x6   :  { %s891_s22 = scalar_lea.vmem %s34_s19, 512  ;;  %p896_p1 = scmp.lt.s32.totalorder %s34_s19, %s34_s19 }
   0x7   :  { %p892_p0 = scmp.ne.s32.totalorder %s34_s19, %s891_s22  ;;  %p897_p2 = scmp.lt.s32.totalorder %s891_s22, %s891_s22 }
   0x9   :  { %p898_p3 = por %p897_p2, %p896_p1 }
   0xb   :  { %p899_p4 = pnand %p898_p3, %p892_p0 }
   0xd   :  { %902 = shalt.err (!%p899_p4)
}
   0xe   :  { %s1015_s23 = smov 128   ;;  %s1016_s24 = smov 8  }
   0xf   :  { %39 = dma.hbm_to_vmem [thread:$0]  %s1142_s1, 512, %s34_s19, [#allocation6], %s1015_s23, %s1015_s23, %s1016_s24  }
  0x10   :  { %s911_s27 = scalar_lea.vmem %s22_s21, 512  ;;  %p916_p6 = scmp.lt.s32.totalorder %s22_s21, %s22_s21 }
  0x11   :  { %p912_p5 = scmp.ne.s32.totalorder %s22_s21, %s911_s27  ;;  %p917_p7 = scmp.lt.s32.totalorder %s911_s27, %s911_s27 }
  0x13   :  { %p918_p8 = por %p917_p7, %p916_p6 }
  0x15   :  { %p919_p9 = pnand %p918_p8, %p912_p5 }
  0x17   :  { %922 = shalt.err (!%p919_p9)
}
  0x18   :  { %27 = dma.hbm_to_vmem [thread:$0]  %s1141_s0, 512, %s22_s21, [#allocation3], %s1015_s23, %s1015_s23, %s1016_s24  }
  0x19   :  { %s1017_s30 = smov [#allocation7]   ;;  %s1018_s7 = smov [#allocation8]  }
  0x1a   :  { %s45_s6 = sshll.u32 %s1017_s30, 4  ;;  %s57_s8 = sshll.u32 %s1018_s7, 4  ;;  %s46_s6 = int_to_ptr.vmem [resolvable:$true] %s45_s6  ;;  %s58_s8 = int_to_ptr.vmem [resolvable:$true] %s57_s8 }
  0x1b   :  { %s931_s1 = scalar_lea.vmem %s46_s6, 512  ;;  %p936_p11 = scmp.lt.s32.totalorder %s46_s6, %s46_s6 }
  0x1c   :  { %p932_p10 = scmp.ne.s32.totalorder %s46_s6, %s931_s1  ;;  %p937_p12 = scmp.lt.s32.totalorder %s931_s1, %s931_s1 }
  0x1e   :  { %p938_p13 = por %p937_p12, %p936_p11 }
  0x20   :  { %p939_p0 = pnand %p938_p13, %p932_p10 }
  0x22   :  { %942 = shalt.err (!%p939_p0)
}
  0x23   :  { %51 = dma.hbm_to_vmem [thread:$0]  %s1143_s2, 512, %s46_s6, [#allocation6], %s1015_s23, %s1015_s23, %s1016_s24  }
  0x24   :  { %s951_s0 = scalar_lea.vmem %s58_s8, 512  ;;  %p956_p2 = scmp.lt.s32.totalorder %s58_s8, %s58_s8 }
  0x25   :  { %p952_p1 = scmp.ne.s32.totalorder %s58_s8, %s951_s0  ;;  %p957_p3 = scmp.lt.s32.totalorder %s951_s0, %s951_s0 }
  0x27   :  { %p958_p4 = por %p957_p3, %p956_p2 }
  0x29   :  { %p959_p5 = pnand %p958_p4, %p952_p1 }
  0x2b   :  { %962 = shalt.err (!%p959_p5)
}
  0x2c   :  { %63 = dma.hbm_to_vmem [thread:$0]  %s1144_s3, 512, %s58_s8, [#allocation9], %s1015_s23, %s1015_s23, %s1016_s24  }
  0x2d   :  { %1003 = dma.done.wait [#allocation3], 512  }
  0x2e   :  { %1004 = vsyncadd [#allocation3], 4294966784 }
  0x2f   :  { %1005 = dma.done.wait [#allocation6], 1024  }
  0x30   :  { %1006 = vsyncadd [#allocation6], 4294966272 }
  0x31   :  { %1007 = dma.done.wait [#allocation9], 512  }
  0x32   :  { %1008 = vsyncadd [#allocation9], 4294966784  ;;  %v1019_v0 = vmov 0.0   ;;  %vm1020_vm0 = vmmov 0   ;;  %vm92_vm1 = vcmask 130048   ;;  %v80_v1 = vld [vmem:[#allocation5] sm:$0xff] }
  0x33   :  { %817 = vmatprep.subr.mxu0 %v1019_v0  ;;  %819 = vmatprep.mubr.msk.f32.mxu0 %vm1020_vm0, %v1019_v0  ;;  %v81_v2 = vld [vmem:[#allocation5 + $0x8] sm:$0xff]  ;;  %v76_v3 = vld [vmem:[#allocation2] sm:$0xff]  ;;  %v82_v5 = vld [vmem:[#allocation5 + $0x10] sm:$0xff]  ;;  %vm409_vm4 = vcmask 64512   ;;  %s1021_s2 = smov [#allocation11]  }
  0x34   :  { %822 = vmatprep.subr.mxu1 %v1019_v0  ;;  %824 = vmatprep.mubr.msk.f32.mxu1 %vm1020_vm0, %v1019_v0  ;;  %v77_v4 = vld [vmem:[#allocation2 + $0x8] sm:$0xff]  ;;  %v83_v6 = vld [vmem:[#allocation5 + $0x18] sm:$0xff]  ;;  %v78_v7 = vld [vmem:[#allocation2 + $0x10] sm:$0xff]  ;;  %s771_s3 = sshll.u32 %s1021_s2, 4  ;;  %s772_s3 = int_to_ptr.vmem [resolvable:$true] %s771_s3 }
  0x35   :  { %818 = vmatpush3.xpose.msk.msra.mxu0 %vm92_vm1, %v80_v1  ;;  %823 = vmatpush3.xpose.msk.msra.mxu1 %vm92_vm1, %v81_v2  ;;  %v79_v8 = vld [vmem:[#allocation2 + $0x18] sm:$0xff]  ;;  %v88_v9 = vld [vmem:[#allocation8] sm:$0xff]  ;;  %v89_v10 = vld [vmem:[#allocation8 + $0x8] sm:$0xff]  ;;  %s963_s13 = scalar_lea.vmem %s772_s3, 512  ;;  %p968_p7 = scmp.lt.s32.totalorder %s772_s3, %s772_s3 }
  0x36   :  { %827 = vmatprep.subr.mxu0 %v1019_v0  ;;  %832 = vmatprep.subr.mxu1 %v1019_v0  ;;  %vm401_vm2 = vcmp.gt.f32.partialorder %v88_v9, 0.5  ;;  %vm402_vm3 = vcmp.gt.f32.partialorder %v89_v10, 0.5  ;;  %v90_v15 = vld [vmem:[#allocation8 + $0x10] sm:$0xff]  ;;  %v91_v18 = vld [vmem:[#allocation8 + $0x18] sm:$0xff]  ;;  %v84_v53 = vld [vmem:[#allocation7] sm:$0xff]  ;;  %p964_p6 = scmp.ne.s32.totalorder %s772_s3, %s963_s13  ;;  %p969_p8 = scmp.lt.s32.totalorder %s963_s13, %s963_s13 }
  0x37   :  { %vm403_vm5 = vcmp.gt.f32.partialorder %v90_v15, 0.5  ;;  %vm404_vm6 = vcmp.gt.f32.partialorder %v91_v18, 0.5  ;;  %v85_v54 = vld [vmem:[#allocation7 + $0x8] sm:$0xff]  ;;  %v86_v61 = vld [vmem:[#allocation7 + $0x10] sm:$0xff]  ;;  %v87_v2 = vld [vmem:[#allocation7 + $0x18] sm:$0xff] }
  0x38   :  { %820 = vmatmul.mubr.msk.f32.vlgmr.msra.gmra.mxu0 %vm92_vm1, %v76_v3  ;;  %825 = vmatmul.mubr.msk.f32.vlgmr.msra.gmra.mxu1 %vm92_vm1, %v77_v4  ;;  %p970_p9 = por %p969_p8, %p968_p7 }
  0x39   :  { %828 = vmatpush3.xpose.msk.msra.mxu0 %vm92_vm1, %v82_v5  ;;  %829 = vmatprep.mubr.msk.f32.mxu0 %vm1020_vm0, %v1019_v0 }
  0x3a   :  { %833 = vmatpush3.xpose.msk.msra.mxu1 %vm92_vm1, %v83_v6  ;;  %834 = vmatprep.mubr.msk.f32.mxu1 %vm1020_vm0, %v1019_v0  ;;  %p971_p10 = pnand %p970_p9, %p964_p6 }
  0x3b   :  { %837 = vmatprep.subr.mxu0 %v1019_v0  ;;  %842 = vmatprep.subr.mxu1 %v1019_v0 }
  0x3c   :  { %830 = vmatmul.mubr.msk.f32.vlgmr.msra.gmra.mxu0 %vm92_vm1, %v78_v7 }
  0x3d   :  { %835 = vmatmul.mubr.msk.f32.vlgmr.msra.gmra.mxu1 %vm92_vm1, %v79_v8  ;;  %839 = vmatprep.mubr.msk.f32.mxu0 %vm1020_vm0, %v1019_v0 }
  0x3e   :  { %844 = vmatprep.mubr.msk.f32.mxu1 %vm1020_vm0, %v1019_v0  ;;  %838 = vmatpush3.msra.mxu0 %v84_v53 }
  0x3f   :  { %847 = vmatprep.subr.mxu0 %v1019_v0  ;;  %843 = vmatpush3.msra.mxu1 %v85_v54 }
  0x40   :  { %852 = vmatprep.subr.mxu1 %v1019_v0 }
  0xf8   :  { %v165_v11 = vpop.f32.mrf.mxu0  ;;  %v241_v12 = vpop.f32.mrf.mxu1 }
  0xf9   :  { %v397_v13 = vmul.f32 0.25, %v165_v11  ;;  %v398_v14 = vmul.f32 0.25, %v241_v12 }
  0xfa   :  { %v821_v16 = vpop.f32.mrf.mxu0  ;;  %v826_v17 = vpop.f32.mrf.mxu1 }
  0xfb   :  { %v405_v19 = vsel %vm401_vm2, -1e+09, %v397_v13  ;;  %v406_v20 = vsel %vm402_vm3, -1e+09, %v398_v14 }
  0xfc   :  { %v317_v21 = vpop.f32.mrf.mxu0  ;;  %v410_v22 = vsel %vm409_vm4, %v405_v19, -inf  ;;  %v413_v27 = vsel %vm409_vm4, %v406_v20, -inf }
  0xfd   :  { %v399_v23 = vmul.f32 0.25, %v317_v21  ;;  %411 = vmax.xlane.f32.xlu0 %v410_v22  ;;  %v393_v24 = vpop.f32.mrf.mxu1 }
  0xfe   :  { %v831_v25 = vpop.f32.mrf.mxu0  ;;  %v400_v26 = vmul.f32 0.25, %v393_v24 }
  0xff   :  { %v836_v28 = vpop.f32.mrf.mxu1  ;;  %v407_v29 = vsel %vm403_vm5, -1e+09, %v399_v23 }
 0x100   :  { %v416_v30 = vsel %vm409_vm4, %v407_v29, -inf  ;;  %v408_v31 = vsel %vm404_vm6, -1e+09, %v400_v26 }
 0x101   :  { %414 = vmax.xlane.f32.xlu0 %v413_v27  ;;  %417 = vmax.xlane.f32.xlu1 %v416_v30  ;;  %v419_v32 = vsel %vm409_vm4, %v408_v31, -inf }
 0x105   :  { %420 = vmax.xlane.f32.xlu1 %v419_v32 }
 0x186   :  { %v412_v33 = vpop.xlane.xlu0 %411 }
 0x187   :  { %v422_v34 = vsub.f32 %v405_v19, %v412_v33 }
 0x189   :  { %v426_v35 = vmul.f32 1.442695, %v422_v34 }
 0x18a   :  { %v415_v36 = vpop.xlane.xlu0 %414  ;;  %v418_v37 = vpop.xlane.xlu1 %417 }
 0x18b   :  { %867 = vpow2.f32 %v426_v35  ;;  %v423_v38 = vsub.f32 %v406_v20, %v415_v36  ;;  %v424_v39 = vsub.f32 %v407_v29, %v418_v37 }
 0x18d   :  { %v428_v40 = vmul.f32 1.442695, %v423_v38  ;;  %v430_v41 = vmul.f32 1.442695, %v424_v39 }
 0x18e   :  { %v421_v42 = vpop.xlane.xlu1 %420 }
 0x18f   :  { %869 = vpow2.f32 %v428_v40  ;;  %v425_v43 = vsub.f32 %v408_v31, %v421_v42 }
 0x190   :  { %871 = vpow2.f32 %v430_v41 }
 0x191   :  { %v432_v44 = vmul.f32 1.442695, %v425_v43 }
 0x193   :  { %873 = vpow2.f32 %v432_v44 }
 0x198   :  { %v868_v45 = vpop.eup %867 }
 0x199   :  { %v434_v46 = vsel %vm409_vm4, %v868_v45, 0.0 }
 0x19a   :  { %435 = vadd.xlane.f32.xlu0 %v434_v46 }
 0x19c   :  { %v870_v47 = vpop.eup %869 }
 0x19d   :  { %v872_v48 = vpop.eup %871  ;;  %v437_v49 = vsel %vm409_vm4, %v870_v47, 0.0 }
 0x19e   :  { %438 = vadd.xlane.f32.xlu1 %v437_v49  ;;  %v440_v50 = vsel %vm409_vm4, %v872_v48, 0.0 }
 0x19f   :  { %441 = vadd.xlane.f32.xlu0 %v440_v50 }
 0x1a0   :  { %v874_v51 = vpop.eup %873 }
 0x1a1   :  { %v443_v52 = vsel %vm409_vm4, %v874_v51, 0.0 }
 0x1a2   :  { %444 = vadd.xlane.f32.xlu1 %v443_v52 }
 0x223   :  { %v436_v55 = vpop.xlane.xlu0 %435 }
 0x224   :  { %875 = vrcp.f32 %v436_v55 }
 0x227   :  { %v439_v56 = vpop.xlane.xlu1 %438 }
 0x228   :  { %v442_v57 = vpop.xlane.xlu0 %441  ;;  %877 = vrcp.f32 %v439_v56 }
 0x229   :  { %879 = vrcp.f32 %v442_v57 }
 0x22b   :  { %v445_v58 = vpop.xlane.xlu1 %444 }
 0x22c   :  { %881 = vrcp.f32 %v445_v58 }
 0x231   :  { %v876_v59 = vpop.eup %875 }
 0x232   :  { %v450_v60 = vmul.f32 %v876_v59, %v868_v45 }
 0x234   :  { %840 = vmatmul.mubr.msk.f32.vlgmr.msra.gmra.mxu0 %vm409_vm4, %v450_v60  ;;  %454 = vst.msk [vmem:[#allocation11] sm:$0xff] %vm409_vm4, %v450_v60 }
 0x235   :  { %v878_v62 = vpop.eup %877  ;;  %848 = vmatpush3.msra.mxu0 %v86_v61  ;;  %849 = vmatprep.mubr.msk.f32.mxu0 %vm1020_vm0, %v1019_v0 }
 0x236   :  { %v880_v63 = vpop.eup %879  ;;  %v451_v1 = vmul.f32 %v878_v62, %v870_v47 }
 0x237   :  { %v452_v3 = vmul.f32 %v880_v63, %v872_v48 }
 0x238   :  { %845 = vmatmul.mubr.msk.f32.vlgmr.msra.gmra.mxu1 %vm409_vm4, %v451_v1  ;;  %455 = vst.msk [vmem:[#allocation11 + $0x8] sm:$0xff] %vm409_vm4, %v451_v1 }
 0x239   :  { %v882_v4 = vpop.eup %881  ;;  %850 = vmatmul.mubr.msk.f32.vlgmr.msra.gmra.mxu0 %vm409_vm4, %v452_v3  ;;  %456 = vst.msk [vmem:[#allocation11 + $0x10] sm:$0xff] %vm409_vm4, %v452_v3  ;;  %853 = vmatpush3.msra.mxu1 %v87_v2 }
 0x23a   :  { %854 = vmatprep.mubr.msk.f32.mxu1 %vm1020_vm0, %v1019_v0  ;;  %v453_v5 = vmul.f32 %v882_v4, %v874_v51 }
 0x23c   :  { %855 = vmatmul.mubr.msk.f32.vlgmr.msra.gmra.mxu1 %vm409_vm4, %v453_v5  ;;  %457 = vst.msk [vmem:[#allocation11 + $0x18] sm:$0xff] %vm409_vm4, %v453_v5 }
 0x23d   :  { %974 = shalt.err (!%p971_p10)
}
 0x23e   :  { %777 = dma.vmem_to_hbm [thread:$0]  %s772_s3, 512, %s1146_s5, [#allocation12], %s1015_s23, %s1015_s23, %s1016_s24  }
 0x23f   :  { %s1022_s16 = smov [#allocation10]  }
 0x240   :  { %s759_s17 = sshll.u32 %s1022_s16, 4  ;;  %s760_s17 = int_to_ptr.vmem [resolvable:$true] %s759_s17 }
 0x241   :  { %s983_s5 = scalar_lea.vmem %s760_s17, 512  ;;  %p988_p12 = scmp.lt.s32.totalorder %s760_s17, %s760_s17 }
 0x242   :  { %p984_p11 = scmp.ne.s32.totalorder %s760_s17, %s983_s5  ;;  %p989_p13 = scmp.lt.s32.totalorder %s983_s5, %s983_s5 }
 0x244   :  { %p990_p0 = por %p989_p13, %p988_p12 }
 0x246   :  { %p991_p1 = pnand %p990_p0, %p984_p11 }
 0x2f4   :  { %v527_v0 = vpop.f32.mrf.mxu0 }
 0x2f5   :  { %750 = vst.msk [vmem:[#allocation10] sm:$0xff] %vm92_vm1, %v527_v0 }
 0x2f6   :  { %v841_v6 = vpop.f32.mrf.mxu0 }
 0x2f8   :  { %v600_v7 = vpop.f32.mrf.mxu1 }
 0x2f9   :  { %751 = vst.msk [vmem:[#allocation10 + $0x8] sm:$0xff] %vm92_vm1, %v600_v7  ;;  %v673_v8 = vpop.f32.mrf.mxu0 }
 0x2fa   :  { %752 = vst.msk [vmem:[#allocation10 + $0x10] sm:$0xff] %vm92_vm1, %v673_v8  ;;  %v846_v9 = vpop.f32.mrf.mxu1 }
 0x2fb   :  { %v851_v10 = vpop.f32.mrf.mxu0 }
 0x2fc   :  { %v746_v11 = vpop.f32.mrf.mxu1 }
 0x2fd   :  { %753 = vst.msk [vmem:[#allocation10 + $0x18] sm:$0xff] %vm92_vm1, %v746_v11 }
 0x2fe   :  { %v856_v12 = vpop.f32.mrf.mxu1 }
 0x2ff   :  { %994 = shalt.err (!%p991_p1)
}
 0x300   :  { %765 = dma.vmem_to_hbm [thread:$0]  %s760_s17, 512, %s1145_s4, [#allocation4], %s1015_s23, %s1015_s23, %s1016_s24  }
 0x301   :  { %1009 = dma.done.wait [#allocation4], 512  }
 0x302   :  { %1010 = vsyncadd [#allocation4], 4294966784 }
 0x303   :  { %1011 = dma.done.wait [#allocation12], 512  }
 0x304   :  { %1012 = vsyncadd [#allocation12], 4294966784 }
 0x305   :  { %784 = vsyncpa [#allocation3], 1 }
 0x306   :  { %785 = vsyncpa [#allocation6], 1 }
 0x307   :  { %786 = vsyncpa [#allocation9], 1 }
 0x308   :  { %787 = vsyncpa [#allocation4], 1 }
 0x309   :  { %788 = vsyncpa [#allocation12], 1 }

</bundles_post_ra>
